<compile_context>
chip_gen: v7x
topology: tpu7x:2x2x1
jax: 0.10.0
libtpu: 0.0.40
codegen_flags: <defaults>
</compile_context>

<pallas_src>
import jax
import jax.numpy as jnp
from jax import lax
from jax.experimental import pallas as pl
from jax.experimental.pallas import tpu as pltpu


def classifier_kernel(xenc_ref, cdir_ref, rel_ref, enc_ref, out_fwd_ref, out_rev_ref):
    """Score one R-tile of labels against all questions.

    labelbase = rel + enc is formed on the VPU in-kernel.  The direction
    embedding enters only as a per-question rank-1 bias, folded in as
        s_dir = 1 / (1 + exp(-base) * exp(-bias_dir))
    which equals sigmoid(xenc @ (rel + dir + enc)^T) for each half.
    (At extreme logits this saturates to exactly 0/1, like the reference.)
    """
    xenc = xenc_ref[...]                              # (Bp, D) f32
    lab = rel_ref[...] + enc_ref[...]                 # (tr, D) f32, VPU add

    dn = (((1,), (1,)), ((), ()))                     # contract shared D axis; no .T
    base = lax.dot_general(xenc, lab, dn,
                           preferred_element_type=jnp.float32)   # (Bp, tr)

    e = jnp.exp(-base)                                # single EUP exp pass per tile
    c = cdir_ref[...]                                 # (Bp, 2) = exp(-xenc @ dir^T)

    out_fwd_ref[...] = pl.reciprocal(1.0 + e * c[:, 0:1], approx=True).astype(out_fwd_ref.dtype)
    out_rev_ref[...] = pl.reciprocal(1.0 + e * c[:, 1:2], approx=True).astype(out_rev_ref.dtype)


def _round_up(x, m):
    return ((x + m - 1) // m) * m


def _vmem_bytes(tr, d, bp):
    """Rough double-buffered working-set estimate for the pallas_call."""
    dbl = 2
    in_tiles = 2 * tr * d * 4 * dbl          # rel tile + enc tile
    out_tiles = 2 * bp * tr * 4 * dbl        # fwd + rev output tiles
    resident = bp * d * 4 * dbl + bp * 128 * 4 * dbl   # xenc + dir bias
    return in_tiles + out_tiles + resident


def classifier_scores(xenc, rel_w, dir_w, label_encs, *, tr=2048):
    """sigmoid(xenc @ cat([rel+dir_fwd+enc, rel+dir_rev+enc], 0)^T) -> (B, 2R)."""
    assert tr % 128 == 0, "R tile must be lane-aligned (multiple of 128)"
    B, D = xenc.shape
    R, _ = rel_w.shape

    Bp = _round_up(B, 8)                       # f32 sublane alignment
    tr = min(tr, _round_up(R, 256))            # clamp for tiny label sets
    while tr > 256 and _vmem_bytes(tr, D, Bp) > (40 << 20):
        tr = max(256, tr // 2)                 # stays a multiple of 128
    Rp = _round_up(R, tr)

    xenc_p = jnp.pad(xenc, ((0, Bp - B), (0, 0))).astype(jnp.float32) if Bp != B \
        else xenc.astype(jnp.float32)

    if Rp != R:
        # Only when R % tr != 0; prefer R a multiple of tr (or precompute padded
        # tables once) to avoid this extra pass over the label table.
        rel_p = jnp.pad(rel_w, ((0, Rp - R), (0, 0))).astype(jnp.float32)
        enc_p = jnp.pad(label_encs, ((0, Rp - R), (0, 0))).astype(jnp.float32)
    else:
        rel_p = rel_w.astype(jnp.float32)
        enc_p = label_encs.astype(jnp.float32)

    # Grid-invariant direction bias, computed once (tiny (B,D)x(D,2) matmul).
    cdir = jnp.exp(-(xenc_p @ dir_w.T.astype(jnp.float32)))       # (Bp, 2)

    need = _vmem_bytes(tr, D, Bp) + (4 << 20)
    vmem_limit = int(min(need, 48 << 20)) if need > (16 << 20) else None

    out_fwd, out_rev = pl.pallas_call(
        classifier_kernel,
        out_shape=(
            jax.ShapeDtypeStruct((Bp, Rp), jnp.float32),
            jax.ShapeDtypeStruct((Bp, Rp), jnp.float32),
        ),
        grid_spec=pltpu.PrefetchScalarGridSpec(
            num_scalar_prefetch=0,
            grid=(Rp // tr,),
            in_specs=[
                pl.BlockSpec((Bp, D), lambda j: (0, 0)),    # xenc   (resident)
                pl.BlockSpec((Bp, 2), lambda j: (0, 0)),    # exp(-dir bias) (resident)
                pl.BlockSpec((tr, D), lambda j: (j, 0)),    # rel_w tile
                pl.BlockSpec((tr, D), lambda j: (j, 0)),    # label_encs tile
            ],
            out_specs=[
                pl.BlockSpec((Bp, tr), lambda j: (0, j)),   # fwd scores tile
                pl.BlockSpec((Bp, tr), lambda j: (0, j)),   # rev scores tile
            ],
        ),
        compiler_params=pltpu.CompilerParams(
            dimension_semantics=("parallel",),
            vmem_limit_bytes=vmem_limit,
        ),
    )(xenc_p, cdir, rel_p, enc_p)

    # fwd block then rev block, dropping padding (matches torch.cat order).
    return jnp.concatenate([out_fwd[:B, :R], out_rev[:B, :R]], axis=1)


# ---- plain-JAX glue: synthetic inpenc / outenc (mean-pool + linear) ---------
# TODO(synk): inpenc/outenc are injected sub-modules in the original; modeled
# here as mean-pool + linear encoders outside the Pallas hot path.
def encode(tokens, w_emb, w_proj):
    """tokens: (N, T) int32 ids; returns (N, D) float32."""
    emb = w_emb[tokens]                 # (N, T, E)
    pooled = emb.mean(axis=1)           # (N, E)
    return pooled @ w_proj              # (N, D)


def classifier_forward(x_tokens, out_tokens, params):
    xenc = encode(x_tokens, params["inp_emb"], params["inp_proj"])          # (B, D)
    label_encs = encode(out_tokens, params["out_emb"], params["out_proj"])  # (R, D)
    return classifier_scores(xenc, params["rel_w"], params["dir_w"], label_encs)


def reference_forward(x_tokens, out_tokens, params):
    """Pure-JAX reference mirroring the PyTorch forward exactly."""
    xenc = encode(x_tokens, params["inp_emb"], params["inp_proj"])
    R = params["rel_w"].shape[0]
    outvecs = jnp.concatenate([params["rel_w"], params["rel_w"]], axis=0)            # (2R, D)
    outvecs_dir = jnp.concatenate(
        [jnp.tile(params["dir_w"][0:1], (R, 1)), jnp.tile(params["dir_w"][1:2], (R, 1))],
        axis=0,
    )                                                                                 # (2R, D)
    labelvecs = outvecs + outvecs_dir
    lab_encs = encode(out_tokens, params["out_emb"], params["out_proj"])
    labelvecs = labelvecs + jnp.concatenate([lab_encs, lab_encs], axis=0)
    scores = jnp.einsum("bi,ki->bk", xenc, labelvecs)
    return jax.nn.sigmoid(scores)


if __name__ == "__main__":
    # Small, deterministic synthetic config.
    B, T = 4, 8          # batch, question length
    R, TL = 16, 6        # numrels, label surface-form length
    V, E = 50, 32        # vocab, token-embedding dim
    D = 128              # outdim

    key = jax.random.PRNGKey(0)
    k = jax.random.split(key, 12)

    params = {
        "inp_emb": jax.random.normal(k[0], (V, E), jnp.float32) * 0.1,
        "inp_proj": jax.random.normal(k[1], (E, D), jnp.float32) * 0.1,
        "out_emb": jax.random.normal(k[2], (V, E), jnp.float32) * 0.1,
        "out_proj": jax.random.normal(k[3], (E, D), jnp.float32) * 0.1,
        "rel_w": jax.random.normal(k[4], (R, D), jnp.float32) * 0.1,   # outvecs_ weight
        "dir_w": jax.random.normal(k[5], (2, D), jnp.float32) * 0.1,   # outvecs_dir_ weight
    }
    x_tokens = jax.random.randint(k[6], (B, T), 0, V, jnp.int32)       # question token ids
    out_tokens = jax.random.randint(k[7], (R, TL), 0, V, jnp.int32)    # relation surface-form ids

    # --- main check: full forward at module-like (small) shapes -------------
    scores = classifier_forward(x_tokens, out_tokens, params)
    scores = jax.block_until_ready(scores)
    ref = reference_forward(x_tokens, out_tokens, params)
    assert scores.shape == (B, 2 * R)
    # approx reciprocal in the sigmoid epilogue -> slightly looser tolerance
    assert jnp.allclose(scores, ref, atol=2e-3, rtol=2e-3), "mismatch vs reference (small R)"

    # --- secondary check: multi-tile grid path (R not tiny, tr forced small) -
    B2, R2 = 8, 384
    xenc2 = jax.random.normal(k[8], (B2, D), jnp.float32) * 0.3
    rel2 = jax.random.normal(k[9], (R2, D), jnp.float32) * 0.1
    dir2 = jax.random.normal(k[10], (2, D), jnp.float32) * 0.1
    enc2 = jax.random.normal(k[11], (R2, D), jnp.float32) * 0.1

    scores2 = classifier_scores(xenc2, rel2, dir2, enc2, tr=128)
    scores2 = jax.block_until_ready(scores2)
    labelvecs2 = jnp.concatenate([rel2 + dir2[0] + enc2, rel2 + dir2[1] + enc2], axis=0)
    ref2 = jax.nn.sigmoid(xenc2 @ labelvecs2.T)
    assert scores2.shape == (B2, 2 * R2)
    assert jnp.allclose(scores2, ref2, atol=2e-3, rtol=2e-3), "mismatch vs reference (multi-tile)"

    print("KERNEL_OK")
</pallas_src>

<mosaic_0001>
module attributes {stable_mosaic.version = 11 : i64} {
  func.func @classifier_kernel(%arg0: i32, %arg1: memref<8x128xf32, #tpu.memory_space<vmem>>, %arg2: memref<8x2xf32, #tpu.memory_space<vmem>>, %arg3: memref<256x128xf32, #tpu.memory_space<vmem>>, %arg4: memref<256x128xf32, #tpu.memory_space<vmem>>, %arg5: memref<8x256xf32, #tpu.memory_space<vmem>>, %arg6: memref<8x256xf32, #tpu.memory_space<vmem>>) attributes {dimension_semantics = [#tpu.dimension_semantics<parallel>], iteration_bounds = array<i64: 1>, scalar_prefetch = 0 : i64, scratch_operands = 0 : i64, tpu.core_type = #tpu.core_type<tc>, window_params = [{pipeline_mode = #tpu.pipeline_mode<synchronous>, transform_indices = @transform_0, window_bounds = array<i64: 8, 128>}, {pipeline_mode = #tpu.pipeline_mode<synchronous>, transform_indices = @transform_1, window_bounds = array<i64: 8, 2>}, {transform_indices = @transform_2, window_bounds = array<i64: 256, 128>}, {transform_indices = @transform_3, window_bounds = array<i64: 256, 128>}, {transform_indices = @transform_4, window_bounds = array<i64: 8, 256>}, {transform_indices = @transform_5, window_bounds = array<i64: 8, 256>}]} {
    %c0 = arith.constant 0 : index
    %c0_0 = arith.constant 0 : index
    %0 = vector.load %arg1[%c0, %c0_0] : memref<8x128xf32, #tpu.memory_space<vmem>>, vector<8x128xf32>
    %c0_1 = arith.constant 0 : index
    %c0_2 = arith.constant 0 : index
    %1 = vector.load %arg3[%c0_1, %c0_2] : memref<256x128xf32, #tpu.memory_space<vmem>>, vector<256x128xf32>
    %c0_3 = arith.constant 0 : index
    %c0_4 = arith.constant 0 : index
    %2 = vector.load %arg4[%c0_3, %c0_4] : memref<256x128xf32, #tpu.memory_space<vmem>>, vector<256x128xf32>
    %3 = arith.addf %1, %2 : vector<256x128xf32>
    %cst = arith.constant dense<0.000000e+00> : vector<8x256xf32>
    %4 = tpu.matmul %0, %3, %cst {dimension_numbers = #tpu.dot_dimension_numbers<[1], [1], [0], [0], [0, 0, 1, 0], [], []>} : vector<8x128xf32>, vector<256x128xf32>, vector<8x256xf32> -> vector<8x256xf32>
    %cst_5 = arith.constant 0.000000e+00 : f32
    %5 = vector.broadcast %cst_5 : f32 to vector<8x256xf32>
    %6 = arith.subf %5, %4 : vector<8x256xf32>
    %7 = math.exp %6 : vector<8x256xf32>
    %c0_6 = arith.constant 0 : index
    %c0_7 = arith.constant 0 : index
    %8 = vector.load %arg2[%c0_6, %c0_7] : memref<8x2xf32, #tpu.memory_space<vmem>>, vector<8x2xf32>
    %9 = vector.extract_strided_slice %8 {offsets = [0, 0], sizes = [8, 1], strides = [1, 1]} : vector<8x2xf32> to vector<8x1xf32>
    %10 = vector.broadcast %9 : vector<8x1xf32> to vector<8x256xf32>
    %11 = arith.mulf %7, %10 : vector<8x256xf32>
    %cst_8 = arith.constant 1.000000e+00 : f32
    %12 = vector.broadcast %cst_8 : f32 to vector<8x256xf32>
    %13 = arith.addf %12, %11 : vector<8x256xf32>
    %14 = tpu.reciprocal %13 {approx = true} : vector<8x256xf32> -> vector<8x256xf32>
    %c0_9 = arith.constant 0 : index
    %c0_10 = arith.constant 0 : index
    %15 = vector.load %arg5[%c0_9, %c0_10] : memref<8x256xf32, #tpu.memory_space<vmem>>, vector<8x256xf32>
    tpu.vector_store %arg5[%c0_9, %c0_10], %14 {strides = array<i32>} : memref<8x256xf32, #tpu.memory_space<vmem>>, vector<8x256xf32>,
    %16 = vector.extract_strided_slice %8 {offsets = [0, 1], sizes = [8, 1], strides = [1, 1]} : vector<8x2xf32> to vector<8x1xf32>
    %17 = vector.broadcast %16 : vector<8x1xf32> to vector<8x256xf32>
    %18 = arith.mulf %7, %17 : vector<8x256xf32>
    %cst_11 = arith.constant 1.000000e+00 : f32
    %19 = vector.broadcast %cst_11 : f32 to vector<8x256xf32>
    %20 = arith.addf %19, %18 : vector<8x256xf32>
    %21 = tpu.reciprocal %20 {approx = true} : vector<8x256xf32> -> vector<8x256xf32>
    %c0_12 = arith.constant 0 : index
    %c0_13 = arith.constant 0 : index
    %22 = vector.load %arg6[%c0_12, %c0_13] : memref<8x256xf32, #tpu.memory_space<vmem>>, vector<8x256xf32>
    tpu.vector_store %arg6[%c0_12, %c0_13], %21 {strides = array<i32>} : memref<8x256xf32, #tpu.memory_space<vmem>>, vector<8x256xf32>,
    return
  }
  func.func @transform_0(%arg0: i32) -> (i32, i32) {
    %c0_i32 = arith.constant 0 : i32
    %c0_i32_0 = arith.constant 0 : i32
    %c0_i32_1 = arith.constant 0 : i32
    return %c0_i32, %c0_i32_0 : i32, i32
  }
  func.func @transform_1(%arg0: i32) -> (i32, i32) {
    %c0_i32 = arith.constant 0 : i32
    %c0_i32_0 = arith.constant 0 : i32
    %c0_i32_1 = arith.constant 0 : i32
    return %c0_i32, %c0_i32_0 : i32, i32
  }
  func.func @transform_2(%arg0: i32) -> (i32, i32) {
    %c0_i32 = arith.constant 0 : i32
    %c0_i32_0 = arith.constant 0 : i32
    return %arg0, %c0_i32 : i32, i32
  }
  func.func @transform_3(%arg0: i32) -> (i32, i32) {
    %c0_i32 = arith.constant 0 : i32
    %c0_i32_0 = arith.constant 0 : i32
    return %arg0, %c0_i32 : i32, i32
  }
  func.func @transform_4(%arg0: i32) -> (i32, i32) {
    %c0_i32 = arith.constant 0 : i32
    %c0_i32_0 = arith.constant 0 : i32
    return %c0_i32, %arg0 : i32, i32
  }
  func.func @transform_5(%arg0: i32) -> (i32, i32) {
    %c0_i32 = arith.constant 0 : i32
    %c0_i32_0 = arith.constant 0 : i32
    return %c0_i32, %arg0 : i32, i32
  }
}

</mosaic_0001>

<bundles_post_ra>
// kernel: tpu_custom_call.1
= control target key start
LH: loop header
LB: loop body
LE: loop exit
PB: predicated region body
PF: predicated region fallthrough
CT: control target
= control target key end

     0   :  { %11 = vsyncpa [#allocation3], 0  ;;  %s566_s0 = inlined_call_operand.vmem [shape: f32[8,128], index: 0, kind: input, shape index: {}]   ;;  %s567_s1 = inlined_call_operand.vmem [shape: f32[8,2], index: 1, kind: input, shape index: {}]   ;;  %s568_s2 = inlined_call_operand.hbm [shape: f32[256,128], index: 2, kind: input, shape index: {}]   ;;  %s569_s3 = inlined_call_operand.hbm [shape: f32[256,128], index: 3, kind: input, shape index: {}]   ;;  %s570_s4 = inlined_call_operand.hbm [shape: f32[8,256], index: 4, kind: output, shape index: {0}]   ;;  %s571_s5 = inlined_call_operand.hbm [shape: f32[8,256], index: 5, kind: output, shape index: {1}]  }
   0x1   :  { %12 = vsyncpa [#allocation6], 0 }
   0x2   :  { %13 = vsyncpa [#allocation4], 0 }
   0x3   :  { %14 = vsyncpa [#allocation9], 0  ;;  %s463_s18 = smov [#allocation2]   ;;  %s367_s22 = scalar_lea.hbm %s568_s2, 4096 }
   0x4   :  { %s24_s19 = sshll.u32 %s463_s18, 4  ;;  %p368_p0 = scmp.ne.s32.totalorder %s568_s2, %s367_s22  ;;  %s25_s19 = int_to_ptr.vmem [resolvable:$true] %s24_s19 }
   0x5   :  { %p371_p1 = scmp.lt.u32.totalorder %s367_s22, %s568_s2 }
   0x7   :  { %p373_p2 = pnand %p371_p1, %p368_p0 }
   0x9   :  { %376 = shalt.err (!%p373_p2)
}
   0xa   :  { %s377_s27 = scalar_lea.vmem %s25_s19, 4096  ;;  %p382_p4 = scmp.lt.s32.totalorder %s25_s19, %s25_s19 }
   0xb   :  { %p378_p3 = scmp.ne.s32.totalorder %s25_s19, %s377_s27  ;;  %p383_p5 = scmp.lt.s32.totalorder %s377_s27, %s377_s27 }
   0xd   :  { %p384_p6 = por %p383_p5, %p382_p4 }
   0xf   :  { %p385_p7 = pnand %p384_p6, %p378_p3 }
  0x11   :  { %388 = shalt.err (!%p385_p7)
}
  0x12   :  { %s464_s28 = smov 128   ;;  %s465_s29 = smov 8  }
  0x13   :  { %30 = dma.hbm_to_vmem [thread:$0]  %s568_s2, 4096, %s25_s19, [#allocation3], %s464_s28, %s464_s28, %s465_s29  }
  0x14   :  { %s466_s7 = smov [#allocation5]   ;;  %s389_s11 = scalar_lea.hbm %s569_s3, 4096 }
  0x15   :  { %s36_s8 = sshll.u32 %s466_s7, 4  ;;  %p390_p8 = scmp.ne.s32.totalorder %s569_s3, %s389_s11  ;;  %s37_s8 = int_to_ptr.vmem [resolvable:$true] %s36_s8 }
  0x16   :  { %p393_p9 = scmp.lt.u32.totalorder %s389_s11, %s569_s3 }
  0x18   :  { %p395_p10 = pnand %p393_p9, %p390_p8 }
  0x1a   :  { %398 = shalt.err (!%p395_p10)
}
  0x1b   :  { %s399_s16 = scalar_lea.vmem %s37_s8, 4096  ;;  %p404_p12 = scmp.lt.s32.totalorder %s37_s8, %s37_s8 }
  0x1c   :  { %p400_p11 = scmp.ne.s32.totalorder %s37_s8, %s399_s16  ;;  %p405_p13 = scmp.lt.s32.totalorder %s399_s16, %s399_s16 }
  0x1e   :  { %p406_p0 = por %p405_p13, %p404_p12 }
  0x20   :  { %p407_p1 = pnand %p406_p0, %p400_p11 }
  0x22   :  { %410 = shalt.err (!%p407_p1)
}
  0x23   :  { %42 = dma.hbm_to_vmem [thread:$0]  %s569_s3, 4096, %s37_s8, [#allocation6], %s464_s28, %s464_s28, %s465_s29  }
  0x24   :  { %455 = dma.done.wait [#allocation3], 4096  }
  0x25   :  { %456 = vsyncadd [#allocation3], 4294963200 }
  0x26   :  { %457 = dma.done.wait [#allocation6], 4096  }
  0x27   :  { %458 = vsyncadd [#allocation6], 4294963200  ;;  %v467_v0 = vmov 0   ;;  %v66_v1 = vld [vmem:[#allocation2 + $0x80] sm:$0xff]  ;;  %v67_v2 = vld [vmem:[#allocation2 + $0x88] sm:$0xff]  ;;  %s470_s21 = smov [#allocation8]  }
  0x28   :  { %353 = vset.pattern.permute.xlu0 %v467_v0  ;;  %v98_v3 = vld [vmem:[#allocation5 + $0x80] sm:$0xff]  ;;  %v99_v4 = vld [vmem:[#allocation5 + $0x88] sm:$0xff]  ;;  %v68_v11 = vld [vmem:[#allocation2 + $0x90] sm:$0xff]  ;;  %v468_v0 = vmov 1   ;;  %s265_s22 = sshll.u32 %s470_s21, 4  ;;  %s535_s22 = int_to_ptr.vmem [resolvable:$true] %s265_s22 }
  0x29   :  { %v130_v5 = vadd.f32 %v98_v3, %v66_v1  ;;  %v50_v6 = vld [vmem:[#allocation2] sm:$0xff]  ;;  %v51_v7 = vld [vmem:[#allocation2 + $0x8] sm:$0xff]  ;;  %v131_v8 = vadd.f32 %v99_v4, %v67_v2  ;;  %v69_v14 = vld [vmem:[#allocation2 + $0x98] sm:$0xff] }
  0x2a   :  { %v82_v9 = vld [vmem:[#allocation5] sm:$0xff]  ;;  %v83_v10 = vld [vmem:[#allocation5 + $0x8] sm:$0xff]  ;;  %v100_v15 = vld [vmem:[#allocation5 + $0x90] sm:$0xff] }
  0x2b   :  { %v114_v12 = vadd.f32 %v82_v9, %v50_v6  ;;  %v115_v13 = vadd.f32 %v83_v10, %v51_v7  ;;  %v101_v16 = vld [vmem:[#allocation5 + $0x98] sm:$0xff]  ;;  %v313_v17 = vpack.c.bf16 %v131_v8, %v130_v5  ;;  %v132_v18 = vadd.f32 %v100_v15, %v68_v11  ;;  %v52_v20 = vld [vmem:[#allocation2 + $0x10] sm:$0xff]  ;;  %v70_v25 = vld [vmem:[#allocation2 + $0xa0] sm:$0xff] }
  0x2c   :  { %v133_v19 = vadd.f32 %v101_v16, %v69_v14  ;;  %v53_v21 = vld [vmem:[#allocation2 + $0x18] sm:$0xff]  ;;  %v84_v22 = vld [vmem:[#allocation5 + $0x10] sm:$0xff]  ;;  %v71_v26 = vld [vmem:[#allocation2 + $0xa8] sm:$0xff] }
  0x2d   :  { %v315_v23 = vpack.c.bf16 %v115_v13, %v114_v12  ;;  %v85_v24 = vld [vmem:[#allocation5 + $0x18] sm:$0xff]  ;;  %314 = vmatprep.subr.bf16.mxu0 %v313_v17  ;;  %v102_v28 = vld [vmem:[#allocation5 + $0xa0] sm:$0xff]  ;;  %v103_v29 = vld [vmem:[#allocation5 + $0xa8] sm:$0xff]  ;;  %v116_v30 = vadd.f32 %v84_v22, %v52_v20 }
  0x2e   :  { %v317_v27 = vpack.c.bf16 %v133_v19, %v132_v18  ;;  %v117_v31 = vadd.f32 %v85_v24, %v53_v21  ;;  %v134_v32 = vadd.f32 %v102_v28, %v70_v25  ;;  %v135_v33 = vadd.f32 %v103_v29, %v71_v26  ;;  %v54_v35 = vld [vmem:[#allocation2 + $0x20] sm:$0xff]  ;;  %v55_v36 = vld [vmem:[#allocation2 + $0x28] sm:$0xff]  ;;  %v72_v40 = vld [vmem:[#allocation2 + $0xb0] sm:$0xff] }
  0x2f   :  { %316 = vmatpush3.bf16.xpose.msra.mxu0 %v315_v23  ;;  %v86_v38 = vld [vmem:[#allocation5 + $0x20] sm:$0xff]  ;;  %v87_v39 = vld [vmem:[#allocation5 + $0x28] sm:$0xff]  ;;  %v73_v41 = vld [vmem:[#allocation2 + $0xb8] sm:$0xff] }
  0x30   :  { %318 = vmatprep.subr.bf16.mxu0 %v317_v27  ;;  %v319_v34 = vpack.c.bf16 %v117_v31, %v116_v30  ;;  %v321_v37 = vpack.c.bf16 %v135_v33, %v134_v32  ;;  %v104_v42 = vld [vmem:[#allocation5 + $0xb0] sm:$0xff]  ;;  %v105_v43 = vld [vmem:[#allocation5 + $0xb8] sm:$0xff]  ;;  %v118_v44 = vadd.f32 %v86_v38, %v54_v35  ;;  %v119_v45 = vadd.f32 %v87_v39, %v55_v36  ;;  %v74_v54 = vld [vmem:[#allocation2 + $0xc0] sm:$0xff] }
  0x31   :  { %v136_v46 = vadd.f32 %v104_v42, %v72_v40  ;;  %v137_v47 = vadd.f32 %v105_v43, %v73_v41  ;;  %v56_v48 = vld [vmem:[#allocation2 + $0x30] sm:$0xff]  ;;  %v57_v50 = vld [vmem:[#allocation2 + $0x38] sm:$0xff]  ;;  %v75_v55 = vld [vmem:[#allocation2 + $0xc8] sm:$0xff] }
  0x32   :  { %v323_v49 = vpack.c.bf16 %v119_v45, %v118_v44  ;;  %v88_v51 = vld [vmem:[#allocation5 + $0x30] sm:$0xff]  ;;  %v89_v52 = vld [vmem:[#allocation5 + $0x38] sm:$0xff]  ;;  %v106_v56 = vld [vmem:[#allocation5 + $0xc0] sm:$0xff] }
  0x33   :  { %v325_v53 = vpack.c.bf16 %v137_v47, %v136_v46  ;;  %v107_v57 = vld [vmem:[#allocation5 + $0xc8] sm:$0xff]  ;;  %v528_v58 = vld [vmem:[%s566_s0] sm:$0xff]  ;;  %v120_v60 = vadd.f32 %v88_v51, %v56_v48  ;;  %v121_v61 = vadd.f32 %v89_v52, %v57_v50  ;;  %v138_v62 = vadd.f32 %v106_v56, %v74_v54  ;;  %v76_v7 = vld [vmem:[#allocation2 + $0xd0] sm:$0xff]  ;;  %s469_s0 = smov [#allocation7]  }
  0x34   :  { %v223_v59 = vld [vmem:[%s567_s1] sm:$0xff]  ;;  %311 = vmatprep.mubr.f32.mxu0 %v528_v58  ;;  %v139_v63 = vadd.f32 %v107_v57, %v75_v55  ;;  %v59_v3 = vld [vmem:[#allocation2 + $0x48] sm:$0xff]  ;;  %v77_v8 = vld [vmem:[#allocation2 + $0xd8] sm:$0xff]  ;;  %s255_s1 = sshll.u32 %s469_s0, 4  ;;  %s256_s1 = int_to_ptr.vmem [resolvable:$true] %s255_s1 }
  0x35   :  { %226 = vperm.xlu0 %353, %v223_v59   ;;  %v327_v1 = vpack.c.bf16 %v121_v61, %v120_v60  ;;  %v58_v2 = vld [vmem:[#allocation2 + $0x40] sm:$0xff]  ;;  %v91_v6 = vld [vmem:[#allocation5 + $0x48] sm:$0xff]  ;;  %v108_v9 = vld [vmem:[#allocation5 + $0xd0] sm:$0xff]  ;;  %s411_s23 = scalar_lea.vmem %s256_s1, 256  ;;  %p416_p3 = scmp.lt.s32.totalorder %s256_s1, %s256_s1 }
  0x36   :  { %v329_v4 = vpack.c.bf16 %v139_v63, %v138_v62  ;;  %v90_v5 = vld [vmem:[#allocation5 + $0x40] sm:$0xff]  ;;  %v109_v10 = vld [vmem:[#allocation5 + $0xd8] sm:$0xff]  ;;  %v123_v12 = vadd.f32 %v91_v6, %v59_v3  ;;  %v140_v13 = vadd.f32 %v108_v9, %v76_v7  ;;  %v60_v16 = vld [vmem:[#allocation2 + $0x50] sm:$0xff]  ;;  %p412_p2 = scmp.ne.s32.totalorder %s256_s1, %s411_s23  ;;  %p417_p4 = scmp.lt.s32.totalorder %s411_s23, %s411_s23 }
  0x37   :  { %320 = vmatpush3.bf16.xpose.msra.mxu0 %v319_v34  ;;  %v122_v11 = vadd.f32 %v90_v5, %v58_v2  ;;  %v141_v14 = vadd.f32 %v109_v10, %v77_v8  ;;  %v61_v17 = vld [vmem:[#allocation2 + $0x58] sm:$0xff]  ;;  %v92_v19 = vld [vmem:[#allocation5 + $0x50] sm:$0xff]  ;;  %v78_v21 = vld [vmem:[#allocation2 + $0xe0] sm:$0xff] }
  0x38   :  { %322 = vmatprep.subr.bf16.mxu0 %v321_v37  ;;  %v93_v20 = vld [vmem:[#allocation5 + $0x58] sm:$0xff]  ;;  %v79_v22 = vld [vmem:[#allocation2 + $0xe8] sm:$0xff]  ;;  %v110_v23 = vld [vmem:[#allocation5 + $0xe0] sm:$0xff]  ;;  %v124_v25 = vadd.f32 %v92_v19, %v60_v16  ;;  %p418_p5 = por %p417_p4, %p416_p3 }
  0x39   :  { %354 = vset.pattern.permute.xlu0 %v468_v0  ;;  %v331_v15 = vpack.c.bf16 %v123_v12, %v122_v11  ;;  %v333_v18 = vpack.c.bf16 %v141_v14, %v140_v13  ;;  %v111_v24 = vld [vmem:[#allocation5 + $0xe8] sm:$0xff]  ;;  %v125_v26 = vadd.f32 %v93_v20, %v61_v17  ;;  %v142_v27 = vadd.f32 %v110_v23, %v78_v21  ;;  %v62_v30 = vld [vmem:[#allocation2 + $0x60] sm:$0xff]  ;;  %v80_v35 = vld [vmem:[#allocation2 + $0xf0] sm:$0xff] }
  0x3a   :  { %238 = vperm.xlu0 %354, %v223_v59   ;;  %v143_v28 = vadd.f32 %v111_v24, %v79_v22  ;;  %v63_v31 = vld [vmem:[#allocation2 + $0x68] sm:$0xff]  ;;  %v94_v33 = vld [vmem:[#allocation5 + $0x60] sm:$0xff]  ;;  %v81_v36 = vld [vmem:[#allocation2 + $0xf8] sm:$0xff]  ;;  %p419_p6 = pnand %p418_p5, %p412_p2 }
  0x3b   :  { %v335_v29 = vpack.c.bf16 %v125_v26, %v124_v25  ;;  %v95_v34 = vld [vmem:[#allocation5 + $0x68] sm:$0xff]  ;;  %v112_v37 = vld [vmem:[#allocation5 + $0xf0] sm:$0xff]  ;;  %v113_v38 = vld [vmem:[#allocation5 + $0xf8] sm:$0xff]  ;;  %v126_v39 = vadd.f32 %v94_v33, %v62_v30 }
  0x3c   :  { %v337_v32 = vpack.c.bf16 %v143_v28, %v142_v27  ;;  %v127_v40 = vadd.f32 %v95_v34, %v63_v31  ;;  %v144_v41 = vadd.f32 %v112_v37, %v80_v35  ;;  %v145_v42 = vadd.f32 %v113_v38, %v81_v36  ;;  %v64_v44 = vld [vmem:[#allocation2 + $0x70] sm:$0xff]  ;;  %v65_v46 = vld [vmem:[#allocation2 + $0x78] sm:$0xff] }
  0x3d   :  { %v96_v47 = vld [vmem:[#allocation5 + $0x70] sm:$0xff]  ;;  %v97_v48 = vld [vmem:[#allocation5 + $0x78] sm:$0xff] }
  0x3e   :  { %v339_v43 = vpack.c.bf16 %v127_v40, %v126_v39  ;;  %v341_v45 = vpack.c.bf16 %v145_v42, %v144_v41  ;;  %v129_v50 = vadd.f32 %v97_v48, %v65_v46 }
  0x3f   :  { %324 = vmatpush3.bf16.xpose.msra.mxu0 %v323_v49  ;;  %v128_v49 = vadd.f32 %v96_v47, %v64_v44 }
  0x40   :  { %326 = vmatprep.subr.bf16.mxu0 %v325_v53 }
  0x41   :  { %v343_v51 = vpack.c.bf16 %v129_v50, %v128_v49 }
  0x47   :  { %328 = vmatpush3.bf16.xpose.msra.mxu0 %v327_v1 }
  0x48   :  { %330 = vmatprep.subr.bf16.mxu0 %v329_v4 }
  0x4f   :  { %332 = vmatpush3.bf16.xpose.msra.mxu0 %v331_v15 }
  0x50   :  { %334 = vmatprep.subr.bf16.mxu0 %v333_v18 }
  0x57   :  { %336 = vmatpush3.bf16.xpose.msra.mxu0 %v335_v29 }
  0x58   :  { %338 = vmatprep.subr.bf16.mxu0 %v337_v32 }
  0x5f   :  { %340 = vmatpush3.bf16.xpose.msra.mxu0 %v339_v43 }
  0x60   :  { %342 = vmatprep.subr.bf16.mxu0 %v341_v45 }
  0x67   :  { %344 = vmatpush3.bf16.xpose.msra.mxu0 %v343_v51 }
  0x6e   :  { %312 = vmatmul.mubr.f32.vlgmr.msra.gmra.mrb[0].mxu0 %v528_v58 }
  0xb4   :  { %v227_v59 = vpop.permute.xlu0 %226 }
  0xb9   :  { %v239_v60 = vpop.permute.xlu0 %238 }
 0x141   :  { %v212_v52 = vpop.f32.mrb[0].mxu0 }
 0x142   :  { %v217_v53 = vsub.f32 0.0, %v212_v52  ;;  %v214_v54 = vpop.f32.mrb[1].mxu0 }
 0x143   :  { %v218_v55 = vsub.f32 0.0, %v214_v54 }
 0x144   :  { %v219_v56 = vmul.f32 1.442695, %v217_v53 }
 0x145   :  { %v221_v57 = vmul.f32 1.442695, %v218_v55 }
 0x146   :  { %355 = vpow2.f32 %v219_v56 }
 0x147   :  { %357 = vpow2.f32 %v221_v57 }
 0x150   :  { %v356_v61 = vpop.eup %355 }
 0x151   :  { %v358_v62 = vpop.eup %357  ;;  %v229_v63 = vmul.f32 %v356_v61, %v227_v59  ;;  %v241_v0 = vmul.f32 %v356_v61, %v239_v60 }
 0x152   :  { %v230_v1 = vmul.f32 %v358_v62, %v227_v59  ;;  %v242_v2 = vmul.f32 %v358_v62, %v239_v60 }
 0x153   :  { %v231_v3 = vadd.f32 1.0, %v229_v63  ;;  %v243_v4 = vadd.f32 1.0, %v241_v0 }
 0x154   :  { %v232_v5 = vadd.f32 1.0, %v230_v1  ;;  %v244_v58 = vadd.f32 1.0, %v242_v2 }
 0x155   :  { %359 = vrcp.f32 %v231_v3 }
 0x156   :  { %361 = vrcp.f32 %v232_v5 }
 0x157   :  { %363 = vrcp.f32 %v243_v4 }
 0x158   :  { %365 = vrcp.f32 %v244_v58 }
 0x15f   :  { %v360_v6 = vpop.eup %359 }
 0x160   :  { %v362_v7 = vpop.eup %361  ;;  %235 = vst [vmem:[#allocation7] sm:$0xff] %v360_v6 }
 0x161   :  { %v364_v8 = vpop.eup %363  ;;  %236 = vst [vmem:[#allocation7 + $0x8] sm:$0xff] %v362_v7 }
 0x162   :  { %v366_v9 = vpop.eup %365  ;;  %247 = vst [vmem:[#allocation8] sm:$0xff] %v364_v8 }
 0x163   :  { %422 = shalt.err (!%p419_p6)
}
 0x164   :  { %s423_s26 = scalar_lea.hbm %s570_s4, 256 }
 0x165   :  { %p424_p7 = scmp.ne.s32.totalorder %s570_s4, %s423_s26  ;;  %p427_p8 = scmp.lt.u32.totalorder %s423_s26, %s570_s4 }
 0x167   :  { %p429_p9 = pnand %p427_p8, %p424_p7 }
 0x169   :  { %432 = shalt.err (!%p429_p9)
}
 0x16a   :  { %258 = dma.vmem_to_hbm [thread:$0]  %s256_s1, 256, %s570_s4, [#allocation4]   ;;  %248 = vst [vmem:[#allocation8 + $0x8] sm:$0xff] %v366_v9 }
 0x16b   :  { %s433_s8 = scalar_lea.vmem %s535_s22, 256  ;;  %p438_p11 = scmp.lt.s32.totalorder %s535_s22, %s535_s22 }
 0x16c   :  { %p434_p10 = scmp.ne.s32.totalorder %s535_s22, %s433_s8  ;;  %p439_p12 = scmp.lt.s32.totalorder %s433_s8, %s433_s8 }
 0x16e   :  { %p440_p13 = por %p439_p12, %p438_p11 }
 0x170   :  { %p441_p0 = pnand %p440_p13, %p434_p10 }
 0x172   :  { %444 = shalt.err (!%p441_p0)
}
 0x173   :  { %s445_s11 = scalar_lea.hbm %s571_s5, 256 }
 0x174   :  { %p446_p1 = scmp.ne.s32.totalorder %s571_s5, %s445_s11  ;;  %p449_p2 = scmp.lt.u32.totalorder %s445_s11, %s571_s5 }
 0x176   :  { %p451_p3 = pnand %p449_p2, %p446_p1 }
 0x178   :  { %454 = shalt.err (!%p451_p3)
}
 0x179   :  { %268 = dma.vmem_to_hbm [thread:$0]  %s535_s22, 256, %s571_s5, [#allocation9]  }
 0x17a   :  { %459 = dma.done.wait [#allocation4], 256  }
 0x17b   :  { %460 = vsyncadd [#allocation4], 4294967040 }
 0x17c   :  { %461 = dma.done.wait [#allocation9], 256  }
 0x17d   :  { %462 = vsyncadd [#allocation9], 4294967040 }
 0x17e   :  { %275 = vsyncpa [#allocation3], 1 }
 0x17f   :  { %276 = vsyncpa [#allocation6], 1 }
 0x180   :  { %277 = vsyncpa [#allocation4], 1 }
 0x181   :  { %278 = vsyncpa [#allocation9], 1 }

</bundles_post_ra>
